<compile_context>
chip_gen: v7x
topology: tpu7x:2x2x1
jax: 0.10.0
libtpu: 0.0.40
codegen_flags: <defaults>
</compile_context>

<pallas_src>
import jax
import jax.numpy as jnp
from jax.experimental import pallas as pl
from jax.experimental.pallas import tpu as pltpu


def _make_kl_kernel(T: float, row_tile: int, C: int, n_valid_rows: int,
                    mask_rows: bool):
    inv_T = 1.0 / float(T)

    def kl_kernel(logits_ref, targets_ref, out_ref):
        l = logits_ref[...].astype(jnp.float32) * inv_T
        t = targets_ref[...].astype(jnp.float32) * inv_T

        # log-sum-exp pieces for log_softmax(logits/T), row-wise.
        l_max = jnp.max(l, axis=-1, keepdims=True)
        l_shift = l - l_max
        log_s_l = jnp.log(jnp.sum(jnp.exp(l_shift), axis=-1, keepdims=True))

        # softmax(targets/T): reuse exp(t_shift) for q -> 2 exps/element total.
        t_max = jnp.max(t, axis=-1, keepdims=True)
        t_shift = t - t_max
        e_t = jnp.exp(t_shift)
        s_t = jnp.sum(e_t, axis=-1, keepdims=True)
        log_s_t = jnp.log(s_t)
        inv_s = 1.0 / s_t           # exact per-row reciprocal (row_tile, 1)
        q = e_t * inv_s

        # Fused log ratio: log_q - log_p
        #   = (t_shift - log_s_t) - (l_shift - log_s_l)
        #   = (t_shift - l_shift) + (log_s_l - log_s_t)
        kl = q * ((t_shift - l_shift) + (log_s_l - log_s_t))

        if mask_rows:
            # Ragged tail: rows past the true row count may contain garbage
            # (possibly Inf/NaN after exp).  Must stay a SELECT, not a multiply.
            row0 = pl.program_id(0) * row_tile
            rows = row0 + jax.lax.broadcasted_iota(jnp.int32, (row_tile, 1), 0)
            kl = jnp.where(rows < n_valid_rows, kl, 0.0)

        # Fold row_tile rows -> 8 sublanes (VPU adds), then one small (8, C)
        # cross-lane reduce (XLU) so the per-block HBM output is only (8, 1).
        kl8 = kl.reshape(row_tile // 8, 8, C).sum(axis=0)        # (8, C)
        out_ref[...] = jnp.sum(kl8, axis=-1, keepdims=True)      # (8, 1)

    return kl_kernel


def soft_target_kl_loss(logits, targets, T, *, target_block_bytes=None):
    assert logits.shape == targets.shape
    orig_shape = logits.shape
    C = orig_shape[-1]
    N = 1
    for d in orig_shape[:-1]:
        N *= d

    # Pass inputs through in their native dtype (bf16 stays bf16); the kernel
    # upcasts to f32 internally.
    logits2d = logits.reshape(N, C)
    targets2d = targets.reshape(N, C)

    # Generation-gated sizing from the hardware (fallback = v7x-safe values).
    try:
        vmem_cap = int(pltpu.get_tpu_info().vmem_capacity_bytes)
    except Exception:
        vmem_cap = 64 << 20
    if target_block_bytes is None:
        # 128 MiB VMEM (v5e/v6e): bigger streaming blocks; 64 MiB (v7x): 2 MiB.
        target_block_bytes = (8 << 20) if vmem_cap >= (100 << 20) else (2 << 20)

    # Only pad when there are fewer than 8 total rows (negligible cost); the
    # general ragged tail is handled in-kernel with a row mask, not a copy.
    # (Zero-pad rows give log_q == log_p exactly -> contribute exactly 0 KL.)
    n_rows = N
    if n_rows < 8:
        pad = 8 - n_rows
        logits2d = jnp.concatenate(
            [logits2d, jnp.zeros((pad, C), logits2d.dtype)], axis=0)
        targets2d = jnp.concatenate(
            [targets2d, jnp.zeros((pad, C), targets2d.dtype)], axis=0)
        n_rows = 8

    # Row tile sized so each input block is ~target_block_bytes of f32 compute;
    # the kernel is streaming / HBM-bound, so big blocks == HBM roofline.
    rows_budget = max(8, target_block_bytes // (C * 4))
    row_tile = min(rows_budget, n_rows)
    if n_rows >= 16:
        # Keep at least 2 grid steps so ("parallel",) can shard the row axis
        # across v7x's two TensorCores (neutral on single-TC v5e/v6e).
        row_tile = min(row_tile, pl.cdiv(n_rows, 2))
    row_tile = max(8, (row_tile // 8) * 8)          # multiple of 8 sublanes

    grid = pl.cdiv(n_rows, row_tile)
    mask_rows = (n_rows % row_tile) != 0

    # VMEM budget: double-buffered input blocks + live f32 temps after the
    # log-ratio fusion (~6 blocks, conservative), capped at 3/4 of physical
    # VMEM (48 MiB on v7x's 64 MiB, 96 MiB on v5e/v6e's 128 MiB).
    in_block_bytes = row_tile * C * (
        logits2d.dtype.itemsize + targets2d.dtype.itemsize)
    f32_block_bytes = row_tile * C * 4
    vmem_est = 2 * in_block_bytes + 6 * f32_block_bytes + (2 << 20)
    vmem_limit = int(min(max(vmem_est, 32 << 20), (vmem_cap * 3) // 4))

    kernel = _make_kl_kernel(T, row_tile, C, N, mask_rows)

    partials = pl.pallas_call(
        kernel,
        out_shape=jax.ShapeDtypeStruct((grid * 8, 1), jnp.float32),
        grid_spec=pltpu.PrefetchScalarGridSpec(
            num_scalar_prefetch=0,
            grid=(grid,),
            in_specs=[
                pl.BlockSpec((row_tile, C), lambda i: (i, 0)),
                pl.BlockSpec((row_tile, C), lambda i: (i, 0)),
            ],
            out_specs=pl.BlockSpec((8, 1), lambda i: (i, 0)),
        ),
        compiler_params=pltpu.CompilerParams(
            dimension_semantics=("parallel",),
            vmem_limit_bytes=vmem_limit,
        ),
    )(logits2d, targets2d)

    # F.kl_div default 'mean' reduction divides by the TOTAL number of
    # (unpadded) elements; masked/padded rows contributed exactly 0.
    return jnp.sum(partials) / jnp.float32(N * C)


def _reference(logits, targets, T):
    l = logits.astype(jnp.float32) / T
    t = targets.astype(jnp.float32) / T
    log_p = jax.nn.log_softmax(l, axis=-1)
    q = jax.nn.softmax(t, axis=-1)
    return jnp.mean(q * (jnp.log(q) - log_p))


if __name__ == "__main__":
    key = jax.random.PRNGKey(0)
    k1, k2 = jax.random.split(key)

    T = 4.0
    batch, seq, hidden = 2, 8, 32
    logits = jax.random.normal(k1, (batch, seq, hidden), dtype=jnp.float32)
    targets = jax.random.normal(k2, (batch, seq, hidden), dtype=jnp.float32)

    loss = soft_target_kl_loss(logits, targets, T)
    loss = jax.block_until_ready(loss)

    ref = _reference(logits, targets, T)
    assert jnp.allclose(loss, ref, atol=1e-5, rtol=1e-5), (loss, ref)

    print("KERNEL_OK")
</pallas_src>

<mosaic_0001>
module attributes {stable_mosaic.version = 11 : i64} {
  func.func @kl_kernel(%arg0: i32, %arg1: memref<8x32xf32, #tpu.memory_space<vmem>>, %arg2: memref<8x32xf32, #tpu.memory_space<vmem>>, %arg3: memref<8x1xf32, #tpu.memory_space<vmem>>) attributes {dimension_semantics = [#tpu.dimension_semantics<parallel>], iteration_bounds = array<i64: 2>, scalar_prefetch = 0 : i64, scratch_operands = 0 : i64, tpu.core_type = #tpu.core_type<tc>, window_params = [{transform_indices = @transform_0, window_bounds = array<i64: 8, 32>}, {transform_indices = @transform_1, window_bounds = array<i64: 8, 32>}, {transform_indices = @transform_2, window_bounds = array<i64: 8, 1>}]} {
    %c0 = arith.constant 0 : index
    %c0_0 = arith.constant 0 : index
    %0 = vector.load %arg1[%c0, %c0_0] : memref<8x32xf32, #tpu.memory_space<vmem>>, vector<8x32xf32>
    %cst = arith.constant 2.500000e-01 : f32
    %1 = vector.broadcast %cst : f32 to vector<8x32xf32>
    %2 = arith.mulf %0, %1 : vector<8x32xf32>
    %c0_1 = arith.constant 0 : index
    %c0_2 = arith.constant 0 : index
    %3 = vector.load %arg2[%c0_1, %c0_2] : memref<8x32xf32, #tpu.memory_space<vmem>>, vector<8x32xf32>
    %cst_3 = arith.constant 2.500000e-01 : f32
    %4 = vector.broadcast %cst_3 : f32 to vector<8x32xf32>
    %5 = arith.mulf %3, %4 : vector<8x32xf32>
    %cst_4 = arith.constant dense<0xFF800000> : vector<8xf32>
    %6 = vector.multi_reduction <maximumf>, %2, %cst_4 [1] : vector<8x32xf32> to vector<8xf32>
    %7 = vector.shape_cast %6 : vector<8xf32> to vector<8x1xf32>
    %8 = vector.broadcast %7 : vector<8x1xf32> to vector<8x32xf32>
    %9 = arith.subf %2, %8 : vector<8x32xf32>
    %10 = math.exp %9 : vector<8x32xf32>
    %cst_5 = arith.constant dense<0.000000e+00> : vector<8xf32>
    %11 = vector.multi_reduction <add>, %10, %cst_5 [1] : vector<8x32xf32> to vector<8xf32>
    %12 = vector.shape_cast %11 : vector<8xf32> to vector<8x1xf32>
    %13 = math.log %12 : vector<8x1xf32>
    %cst_6 = arith.constant dense<0xFF800000> : vector<8xf32>
    %14 = vector.multi_reduction <maximumf>, %5, %cst_6 [1] : vector<8x32xf32> to vector<8xf32>
    %15 = vector.shape_cast %14 : vector<8xf32> to vector<8x1xf32>
    %16 = vector.broadcast %15 : vector<8x1xf32> to vector<8x32xf32>
    %17 = arith.subf %5, %16 : vector<8x32xf32>
    %18 = math.exp %17 : vector<8x32xf32>
    %cst_7 = arith.constant dense<0.000000e+00> : vector<8xf32>
    %19 = vector.multi_reduction <add>, %18, %cst_7 [1] : vector<8x32xf32> to vector<8xf32>
    %20 = vector.shape_cast %19 : vector<8xf32> to vector<8x1xf32>
    %21 = math.log %20 : vector<8x1xf32>
    %cst_8 = arith.constant 1.000000e+00 : f32
    %22 = vector.broadcast %cst_8 : f32 to vector<8x1xf32>
    %23 = arith.divf %22, %20 : vector<8x1xf32>
    %24 = vector.broadcast %23 : vector<8x1xf32> to vector<8x32xf32>
    %25 = arith.mulf %18, %24 : vector<8x32xf32>
    %26 = arith.subf %17, %9 : vector<8x32xf32>
    %27 = arith.subf %13, %21 : vector<8x1xf32>
    %28 = vector.broadcast %27 : vector<8x1xf32> to vector<8x32xf32>
    %29 = arith.addf %26, %28 : vector<8x32xf32>
    %30 = arith.mulf %25, %29 : vector<8x32xf32>
    %31 = vector.shape_cast %30 : vector<8x32xf32> to vector<1x8x32xf32>
    %cst_9 = arith.constant dense<0.000000e+00> : vector<8x32xf32>
    %32 = vector.multi_reduction <add>, %31, %cst_9 [0] : vector<1x8x32xf32> to vector<8x32xf32>
    %cst_10 = arith.constant dense<0.000000e+00> : vector<8xf32>
    %33 = vector.multi_reduction <add>, %32, %cst_10 [1] : vector<8x32xf32> to vector<8xf32>
    %34 = vector.shape_cast %33 : vector<8xf32> to vector<8x1xf32>
    %c0_11 = arith.constant 0 : index
    %c0_12 = arith.constant 0 : index
    %35 = vector.load %arg3[%c0_11, %c0_12] : memref<8x1xf32, #tpu.memory_space<vmem>>, vector<8x1xf32>
    tpu.vector_store %arg3[%c0_11, %c0_12], %34 {strides = array<i32>} : memref<8x1xf32, #tpu.memory_space<vmem>>, vector<8x1xf32>,
    return
  }
  func.func @transform_0(%arg0: i32) -> (i32, i32) {
    %c0_i32 = arith.constant 0 : i32
    %c0_i32_0 = arith.constant 0 : i32
    return %arg0, %c0_i32 : i32, i32
  }
  func.func @transform_1(%arg0: i32) -> (i32, i32) {
    %c0_i32 = arith.constant 0 : i32
    %c0_i32_0 = arith.constant 0 : i32
    return %arg0, %c0_i32 : i32, i32
  }
  func.func @transform_2(%arg0: i32) -> (i32, i32) {
    %c0_i32 = arith.constant 0 : i32
    %c0_i32_0 = arith.constant 0 : i32
    return %arg0, %c0_i32 : i32, i32
  }
}

</mosaic_0001>

<bundles_post_ra>
// kernel: tpu_custom_call.1
= control target key start
LH: loop header
LB: loop body
LE: loop exit
PB: predicated region body
PF: predicated region fallthrough
CT: control target
= control target key end

     0   :  { %7 = vsyncpa [#allocation3], 0  ;;  %s667_s0 = inlined_call_operand.hbm [shape: f32[16,32], index: 0, kind: input, shape index: {}]   ;;  %s668_s1 = inlined_call_operand.hbm [shape: f32[16,32], index: 1, kind: input, shape index: {}]   ;;  %s669_s2 = inlined_call_operand.vmem [shape: f32[16,1], index: 2, kind: output, shape index: {}]  }
   0x1   :  { %9 = vsyncpa [#allocation3 + $0x1], 0 }
   0x2   :  { %10 = vsyncpa [#allocation5], 0 }
   0x3   :  { %12 = vsyncpa [#allocation5 + $0x1], 0  ;;  %s508_s9 = smov 0   ;;  %s510_s10 = smov 0  }
   0x4   :  { %s512_s11 = smov 0   ;;  %s514_s12 = smov 0  }
   0x5 LB: > { %s527_s13 = sadd.s32 4294967295, %s489_s12   ;;  %s530_s14 = sadd.s32 1, %s489_s12   ;;  %s489_s12 = sphi %s514_s12, %s681_s12   ;;  %s485_s11 = sphi %s512_s11, %s680_s11   ;;  %s481_s10 = sphi %s510_s10, %s679_s10   ;;  %s477_s9 = sphi %s508_s9, %s678_s9  }
   0x6   : > { %s22_s15 = ssub.s32 %s489_s12, %s530_s14  ;;  %s25_s16 = sadd.s32 1, %s485_s11 }
   0x7   : > { %p23_p0 = scmp.eq.s32.totalorder %s22_s15, 0  ;;  %p32_p1 = scmp.ne.s32.totalorder %s485_s11, %s481_s10 }
   0x8   : > { %p33_p2 = scmp.eq.s32.totalorder %s489_s12, 0  ;;  %p38_p3 = scmp.ne.s32.totalorder %s481_s10, %s477_s9 }
   0x9   : > { %s540_s17 = scalar_select %p23_p0, %s485_s11, %s25_s16  }
   0xa   : > { %p34_p4 = por %p33_p2, %p32_p1  ;;  %p39_p5 = scmp.eq.s32.totalorder %s527_s13, 0 }
   0xb   : > { %p348_p6 = scmp.lt.s32.totalorder %s489_s12, 2  ;;  %s549_s19 = sand.u32 1, %s485_s11  }
   0xc   : > { %p544_p7 = por %p39_p5, %p38_p3  ;;  %s327_s20 = sshll.u32 %s549_s19, 3 }
   0xd   : > { %s328_s21 = sshll.u32 %s489_s12, 7  ;;  %s118_s25 = scalar_lea.vmem [#allocation2], %s327_s20 }
   0xe   : > { %s671_s18 = scalar_select %p544_p7, 1, 0 }
   0xf   : > { %s558_s24 = scalar_lea.hbm %s667_s0, %s328_s21  ;;  %s125_s26 = sshll.u32 %s118_s25, 4  ;;  %s562_s26 = int_to_ptr.vmem [resolvable:$true] %s125_s26 }
  0x10   : > { %p564_p8 = pnand %p348_p6, %p34_p4  ;;  %s115_s28 = scalar_lea.sflag [#allocation3], %s549_s19 }
  0x11   : > { %s391_s29 = scalar_lea.hbm %s558_s24, 128  ;;  %s396_s4 = scalar_lea.hbm %s667_s0, 256 }
  0x12   : > { %p392_p11 = scmp.ne.s32.totalorder %s558_s24, %s391_s29  ;;  %p393_p12 = pneg %p564_p8 }
  0x13   : > { %p397_p1 = scmp.lt.u32.totalorder %s558_s24, %s667_s0  ;;  %p398_p2 = scmp.lt.u32.totalorder %s396_s4, %s391_s29 }
  0x14   : > { %p394_p13 = pnand %p393_p12, %p392_p11  ;;  %p400_p4 = scmp.lt.u32.totalorder %s391_s29, %s558_s24 }
  0x15   : > { %p399_p3 = por %p398_p2, %p397_p1 }
  0x16   : > { %p395_p0 = pneg %p394_p13 }
  0x17   : > { %p401_p5 = por %p400_p4, %p399_p3 }
  0x19   : > { %p402_p6 = pnand %p401_p5, %p395_p0 }
  0x1b   : > { %405 = shalt.err (!%p402_p6)
}
  0x1c   : > { %s406_s7 = scalar_lea.vmem %s562_s26, 128  ;;  %s491_s8 = smov [#allocation2]  }
  0x1d   : > { %p407_p11 = scmp.ne.s32.totalorder %s562_s26, %s406_s7  ;;  %s411_s9 = sshll.u32 %s491_s8, 4  ;;  %s412_s9 = int_to_ptr.vmem [resolvable:$false] %s411_s9 }
  0x1e   : > { %s413_s15 = scalar_lea.vmem %s412_s9, 256  ;;  %p414_p10 = scmp.lt.s32.totalorder %s562_s26, %s412_s9 }
  0x1f   : > { %p409_p13 = pnand %p407_p11, %p393_p12  ;;  %p415_p1 = scmp.lt.s32.totalorder %s413_s15, %s406_s7 }
  0x21   : > { %p410_p9 = pneg %p409_p13  ;;  %p416_p2 = por %p415_p1, %p414_p10 }
  0x23   : > { %p417_p3 = pnand %p416_p2, %p410_p9 }
  0x25   : > { %420 = shalt.err (!%p417_p3)
}
  0x26   : > { %344 = dma.hbm_to_vmem [thread:$0]  (!%p564_p8), %s558_s24, 128, %s562_s26, %s115_s28  }
  0x27   : > { %p673_p0 = scmp.lt.s32.totalorder %s489_s12, 3  ;;  %p674_p4 = scmp.ge.s32.totalorder %s489_s12, 1 }
  0x28   : > { %s609_s25 = scalar_lea.hbm %s668_s1, %s328_s21  ;;  %s136_s29 = scalar_lea.vmem [#allocation4], %s327_s20 }
  0x29   : > { %p600_p5 = pnand %p674_p4, %p673_p0  ;;  %s143_s30 = sshll.u32 %s136_s29, 4  ;;  %s144_s30 = int_to_ptr.vmem [resolvable:$true] %s143_s30 }
  0x2a   : > { %s133_s24 = scalar_lea.sflag [#allocation5], %s549_s19  ;;  %s421_s26 = scalar_lea.hbm %s609_s25, 128 }
  0x2b   : > { %s675_s16 = scalar_select %p600_p5, 1, 0 }
  0x2c   : > { %p422_p9 = scmp.ne.s32.totalorder %s609_s25, %s421_s26  ;;  %s426_s21 = scalar_lea.hbm %s668_s1, 256 }
  0x2d   : > { %p427_p11 = scmp.lt.u32.totalorder %s609_s25, %s668_s1  ;;  %p428_p13 = scmp.lt.u32.totalorder %s426_s21, %s421_s26 }
  0x2e   : > { %p424_p10 = pnand %p422_p9, %p393_p12  ;;  %p430_p2 = scmp.lt.u32.totalorder %s421_s26, %s609_s25 }
  0x2f   : > { %p429_p1 = por %p428_p13, %p427_p11 }
  0x30   : > { %p425_p6 = pneg %p424_p10 }
  0x31   : > { %p431_p3 = por %p430_p2, %p429_p1 }
  0x33   : > { %p432_p0 = pnand %p431_p3, %p425_p6 }
  0x35   : > { %435 = shalt.err (!%p432_p0)
}
  0x36   : > { %s436_s19 = scalar_lea.vmem %s144_s30, 128  ;;  %s492_s20 = smov [#allocation4]  }
  0x37   : > { %p437_p4 = scmp.ne.s32.totalorder %s144_s30, %s436_s19  ;;  %s441_s5 = sshll.u32 %s492_s20, 4  ;;  %s442_s5 = int_to_ptr.vmem [resolvable:$false] %s441_s5 }
  0x38   : > { %s443_s6 = scalar_lea.vmem %s442_s5, 256  ;;  %p444_p7 = scmp.lt.s32.totalorder %s144_s30, %s442_s5 }
  0x39   : > { %p439_p9 = pnand %p437_p4, %p393_p12  ;;  %p445_p5 = scmp.lt.s32.totalorder %s443_s6, %s436_s19 }
  0x3b   : > { %p440_p10 = pneg %p439_p9  ;;  %p446_p11 = por %p445_p5, %p444_p7 }
  0x3d   : > { %p447_p13 = pnand %p446_p11, %p440_p10 }
  0x3f   : > { %450 = shalt.err (!%p447_p13)
}
  0x40   : > { %347 = dma.hbm_to_vmem [thread:$0]  (!%p564_p8), %s609_s25, 128, %s144_s30, %s133_s24  }
  0x41   : > { %p676_p6 = scmp.ne.s32.totalorder %s675_s16, 0 }
  0x42   : > { %s154_s7 = sand.u32 (!%p676_p6), 1, %s481_s10   ;;  %p677_p12 = scmp.ne.s32.totalorder (!%p676_p6), %s671_s18, 0 }
  0x43   : > { %152 = sbr.rel (%p676_p6) target bundleno = 548 (0x224), region = 28  ;;  %s332_s8 = sshll.u32 (!%p676_p6), %s154_s7, 3 }
  0x44   : > { %s155_s9 = scalar_lea.sflag (!%p676_p6), [#allocation3], %s154_s7  ;;  %s158_s15 = scalar_lea.vmem (!%p676_p6), [#allocation2], %s332_s8 }
  0x4a   : > { %468 = dma.done.wait (%p677_p12), %s155_s9, 128  }
  0x4b   : > { %470 = vsyncadd (%p677_p12), %s155_s9, 4294967168  ;;  %s164_s22 = scalar_lea.sflag [#allocation5], %s154_s7  ;;  %s167_s23 = scalar_lea.vmem [#allocation4], %s332_s8 }
  0x4c   : > { %472 = dma.done.wait (%p677_p12), %s164_s22, 128  }
  0x4d   : > { %474 = vsyncadd (%p677_p12), %s164_s22, 4294967168  ;;  %v196_v0 = vld [vmem:[%s158_s15] sm:$0xff]  ;;  %vm200_vm0 = vcmask 261120   ;;  %v198_v1 = vld [vmem:[%s167_s23] sm:$0xff]  ;;  %p192_p7 = scmp.lt.s32.totalorder %s527_s13, 1  ;;  %vm234_vm1 = vcmask 7168  }
  0x4e   : > { %v197_v2 = vmul.f32 0.25, %v196_v0  ;;  %v199_v3 = vmul.f32 0.25, %v198_v1 }
  0x4f   : > { %s683_s13 = smov (!%p192_p7, %s527_s13), 1 }
  0x50   : > { %v201_v4 = vsel %vm200_vm0, %v197_v2, -inf  ;;  %v212_v5 = vsel %vm200_vm0, %v199_v3, -inf  ;;  %s334_s18 = sshll.u32 %s683_s13, 3 }
  0x51   : > { %202 = vmax.xlane.f32.xlu0 %v201_v4  ;;  %s195_s25 = scalar_lea.vmem %s669_s2, %s334_s18 }
  0x55   : > { %213 = vmax.xlane.f32.xlu0 %v212_v5 }
  0xde   : > { %v203_v6 = vpop.xlane.xlu0 %202 }
  0xdf   : > { %v204_v7 = vsub.f32 %v197_v2, %v203_v6 }
  0xe1   : > { %v205_v8 = vmul.f32 1.442695, %v204_v7 }
  0xe2   : > { %v214_v9 = vpop.xlane.xlu0 %213 }
  0xe3   : > { %381 = vpow2.f32 %v205_v8  ;;  %v215_v10 = vsub.f32 %v199_v3, %v214_v9 }
  0xe5   : > { %v216_v11 = vmul.f32 1.442695, %v215_v10  ;;  %v226_v12 = vsub.f32 %v215_v10, %v204_v7 }
  0xe7   : > { %383 = vpow2.f32 %v216_v11 }
  0xed   : > { %v382_v13 = vpop.eup %381 }
  0xee   : > { %v207_v14 = vsel %vm200_vm0, %v382_v13, 0.0 }
  0xef   : > { %208 = vadd.xlane.f32.xlu1 %v207_v14 }
  0xf1   : > { %v384_v15 = vpop.eup %383 }
  0xf2   : > { %v218_v16 = vsel %vm200_vm0, %v384_v15, 0.0 }
  0xf3   : > { %219 = vadd.xlane.f32.xlu1 %v218_v16 }
 0x17c   : > { %v209_v17 = vpop.xlane.xlu1 %208 }
 0x17d   : > { %385 = vlog2.f32 %v209_v17 }
 0x180   : > { %v220_v18 = vpop.xlane.xlu1 %219 }
 0x181   : > { %387 = vlog2.f32 %v220_v18 }
 0x182   : > { %389 = vrcp.f32 %v220_v18 }
 0x187   : > { %v386_v19 = vpop.eup %385 }
 0x188   : > { %v211_v21 = vmul.f32 0.6931472, %v386_v19 }
 0x18b   : > { %v388_v20 = vpop.eup %387 }
 0x18c   : > { %v222_v22 = vmul.f32 0.6931472, %v388_v20  ;;  %v390_v23 = vpop.eup %389 }
 0x18d   : > { %v225_v25 = vmul.f32 %v390_v23, %v384_v15 }
 0x18e   : > { %v227_v24 = vsub.f32 %v211_v21, %v222_v22 }
 0x190   : > { %v228_v26 = vadd.f32 %v227_v24, %v226_v12 }
 0x192   : > { %v229_v27 = vmul.f32 %v228_v26, %v225_v25 }
 0x194   : > { %v231_v28 = vsel %vm200_vm0, %v229_v27, 0.0 }
 0x195   : > { %232 = vadd.xlane.f32.xlu0 %v231_v28 }
 0x222   : > { %v233_v29 = vpop.xlane.xlu0 %232 }
 0x223   : > { %235 = vst.msk [vmem:[%s195_s25] sm:$0xff] %vm234_vm1, %v233_v29 }
 0x224 PF: > { %p15_p8 = scmp.ge.s32.totalorder %s530_s14, 4   ;;  %s678_s9 = smov %s481_s10 }
 0x225   : > { %s679_s10 = smov %s485_s11  ;;  %s680_s11 = smov %s540_s17 }
 0x226   : > { %s681_s12 = smov %s530_s14  ;;  %17 = sbr.rel (!%p15_p8) target bundleno = 5 (0x5), region = 81 }
 0x22d   :  { %255 = vsyncpa [#allocation3], 1 }
 0x22e   :  { %257 = vsyncpa [#allocation3 + $0x1], 1 }
 0x22f   :  { %258 = vsyncpa [#allocation5], 1 }
 0x230   :  { %260 = vsyncpa [#allocation5 + $0x1], 1 }

</bundles_post_ra>
